<compile_context>
chip_gen: v7x
topology: tpu7x:2x2x1
jax: 0.10.0
libtpu: 0.0.40
codegen_flags: <defaults>
</compile_context>

<pallas_src>
import jax
import jax.numpy as jnp
import numpy as np
from jax import lax
from jax.experimental import pallas as pl
from jax.experimental.pallas import tpu as pltpu


def _block_kernel(x_ref, w1_ref, w2_ref, s1_ref, b1_ref, s2_ref, b2_ref, o_ref):
  """One batch element per grid step, flattened (H, W*C) pixel-channel layout.

  x_ref  : (1, H, WC)  bf16   input  (WC = W*C, lane-dense)
  w1_ref : (3, WC, WC) bf16   conv1 block-banded weights (one matrix per ky)
  w2_ref : (3, WC, WC) bf16   conv2 block-banded weights
  s1_ref, b1_ref : (1, WC) f32   folded BN1 scale / bias (tiled per pixel)
  s2_ref, b2_ref : (1, WC) f32   folded BN2 scale / bias (tiled per pixel)
  o_ref  : (1, H, WC)  bf16   output
  """
  H = x_ref.shape[1]

  # +-1 row-shift matrices for the vertical conv taps.  Tiny (H, H) bf16 0/1
  # constants; the shift runs as an extra (H,H)x(H,WC) pass on the MXU, so no
  # misaligned sublane loads/stores or masked selects are needed anywhere.
  r = lax.broadcasted_iota(jnp.int32, (H, H), 0)
  c = lax.broadcasted_iota(jnp.int32, (H, H), 1)
  shift_dn = (r == c + 1).astype(jnp.bfloat16)   # (shift_dn @ a)[h] = a[h-1], row 0   -> 0
  shift_up = (c == r + 1).astype(jnp.bfloat16)   # (shift_up @ a)[h] = a[h+1], row H-1 -> 0

  def conv3x3(act_f32, w_ref):
    # y[h] = a[h-1] @ w[0] + a[h] @ w[1] + a[h+1] @ w[2]
    # Horizontal taps and horizontal zero-padding live inside the banded
    # weight matrices; out-of-range rows contribute zero via the shift mats.
    a_c = act_f32.astype(jnp.bfloat16)
    a_dn = jnp.dot(shift_dn, a_c,
                   preferred_element_type=jnp.float32).astype(jnp.bfloat16)
    a_up = jnp.dot(shift_up, a_c,
                   preferred_element_type=jnp.float32).astype(jnp.bfloat16)
    y = jnp.dot(a_dn, w_ref[0], preferred_element_type=jnp.float32)
    y = y + jnp.dot(a_c, w_ref[1], preferred_element_type=jnp.float32)
    y = y + jnp.dot(a_up, w_ref[2], preferred_element_type=jnp.float32)
    return y

  x = x_ref[0].astype(jnp.float32)                                   # (H, WC)
  a1 = jnp.maximum(x * s1_ref[...] + b1_ref[...], 0.0)               # BN1 + ReLU
  y1 = conv3x3(a1, w1_ref)                                           # conv1
  a2 = jnp.maximum(y1 * s2_ref[...] + b2_ref[...], 0.0)              # BN2 + ReLU
  y2 = conv3x3(a2, w2_ref)                                           # conv2
  o_ref[0] = (y2 + x).astype(o_ref.dtype)                            # residual


def prepare_block_params(params, width, eps=1e-5):
  """One-time prep: fold BN (inference mode), build block-banded bf16 weights.

  Returns per-ky banded matrices of shape (3, W*Cin, W*Cout) and per-pixel
  tiled BN scale/bias vectors of shape (1, W*C).
  """
  w1, w2 = params["w1"], params["w2"]            # (3, 3, Ci, Co) HWIO
  ci, co = w1.shape[2], w1.shape[3]
  assert ci == co, "stride=1 residual path requires in_channel == out_channel"

  s1 = params["gamma1"] / jnp.sqrt(params["var1"] + eps)
  b1 = params["beta1"] - params["mean1"] * s1
  s2 = params["gamma2"] / jnp.sqrt(params["var2"] + eps)
  b2 = params["beta2"] - params["mean2"] * s2

  # Banding tensor: B[kx, w_in, w_out] = 1 iff w_in == w_out + kx - 1
  # (horizontal zero-padding is implicit: out-of-range w_in simply has no row).
  kx = np.arange(3)[:, None, None]
  wi = np.arange(width)[None, :, None]
  wo = np.arange(width)[None, None, :]
  band = jnp.asarray((wi == wo + kx - 1).astype(np.float32))

  def banded(w):  # (3, 3, ci, co) -> (3, width*ci, width*co), bf16
    m = jnp.einsum("ykio,kab->yaibo", w, band)
    return m.reshape(3, width * w.shape[2], width * w.shape[3]).astype(jnp.bfloat16)

  def tiled(v):   # (c,) -> (1, width*c), f32
    return jnp.tile(v, width).reshape(1, width * v.shape[0]).astype(jnp.float32)

  return {
      "w1b": banded(w1), "w2b": banded(w2),
      "s1": tiled(s1), "b1": tiled(b1),
      "s2": tiled(s2), "b2": tiled(b2),
  }


def proposed_block(x_nhwc, prepared):
  """Pallas ProposedBlock forward (stride=1). x_nhwc: (N, H, W, C). Returns bf16."""
  N, H, W, C = x_nhwc.shape
  WC = W * C
  w1b, w2b = prepared["w1b"], prepared["w2b"]
  assert w1b.shape == (3, WC, WC) and w2b.shape == (3, WC, WC), (
      "prepared params do not match input width/channels")
  assert WC <= 2048, "banded-weight form targets small/medium W*C"

  # Flattened lane-dense pixel-channel layout; bf16 kernel I/O.
  x_flat = x_nhwc.reshape(N, H, WC).astype(jnp.bfloat16)

  grid_spec = pltpu.PrefetchScalarGridSpec(
      num_scalar_prefetch=0,
      grid=(N,),
      in_specs=[
          pl.BlockSpec((1, H, WC), lambda n: (n, 0, 0)),
          pl.BlockSpec((3, WC, WC), lambda n: (0, 0, 0)),
          pl.BlockSpec((3, WC, WC), lambda n: (0, 0, 0)),
          pl.BlockSpec((1, WC), lambda n: (0, 0)),
          pl.BlockSpec((1, WC), lambda n: (0, 0)),
          pl.BlockSpec((1, WC), lambda n: (0, 0)),
          pl.BlockSpec((1, WC), lambda n: (0, 0)),
      ],
      out_specs=pl.BlockSpec((1, H, WC), lambda n: (n, 0, 0)),
  )

  out_flat = pl.pallas_call(
      _block_kernel,
      out_shape=jax.ShapeDtypeStruct((N, H, WC), jnp.bfloat16),
      grid_spec=grid_spec,
      compiler_params=pltpu.CompilerParams(
          # batch elements are independent -> shard grid across TensorCores.
          dimension_semantics=("parallel",)),
  )(x_flat, w1b, w2b,
    prepared["s1"], prepared["b1"], prepared["s2"], prepared["b2"])

  return out_flat.reshape(N, H, W, C)


# ---------------- pure-JAX reference (for verification) ----------------
def _conv3x3_same(x, w):
  return lax.conv_general_dilated(
      x, w, window_strides=(1, 1), padding="SAME",
      dimension_numbers=("NHWC", "HWIO", "NHWC"))


def ref_forward(x_nhwc, params, eps=1e-5):
  s1 = params["gamma1"] / jnp.sqrt(params["var1"] + eps)
  b1 = params["beta1"] - params["mean1"] * s1
  s2 = params["gamma2"] / jnp.sqrt(params["var2"] + eps)
  b2 = params["beta2"] - params["mean2"] * s2

  a1 = jnp.maximum(x_nhwc * s1 + b1, 0.0)
  y1 = _conv3x3_same(a1, params["w1"])
  a2 = jnp.maximum(y1 * s2 + b2, 0.0)
  y2 = _conv3x3_same(a2, params["w2"])
  return y2 + x_nhwc


def init_params(key, in_channel, out_channel):
  ks = jax.random.split(key, 10)
  return {
      "w1": 0.1 * jax.random.normal(ks[0], (3, 3, in_channel, out_channel),
                                    jnp.float32),
      "w2": 0.1 * jax.random.normal(ks[1], (3, 3, out_channel, out_channel),
                                    jnp.float32),
      "gamma1": 1.0 + 0.1 * jax.random.normal(ks[2], (in_channel,), jnp.float32),
      "beta1": 0.1 * jax.random.normal(ks[3], (in_channel,), jnp.float32),
      "mean1": 0.1 * jax.random.normal(ks[4], (in_channel,), jnp.float32),
      "var1": 0.5 + jax.random.uniform(ks[5], (in_channel,), jnp.float32),
      "gamma2": 1.0 + 0.1 * jax.random.normal(ks[6], (out_channel,), jnp.float32),
      "beta2": 0.1 * jax.random.normal(ks[7], (out_channel,), jnp.float32),
      "mean2": 0.1 * jax.random.normal(ks[8], (out_channel,), jnp.float32),
      "var2": 0.5 + jax.random.uniform(ks[9], (out_channel,), jnp.float32),
      # downsample conv weights (unused: stride=1 path; see TODO above)
      "w_ds": 0.1 * jax.random.normal(ks[0], (3, 3, in_channel, out_channel),
                                      jnp.float32),
  }


if __name__ == "__main__":
  key = jax.random.PRNGKey(0)
  k_x, k_p = jax.random.split(key)

  N, C, H, W = 2, 8, 16, 16                         # in_channel == out_channel
  x_nchw = jax.random.normal(k_x, (N, C, H, W), jnp.float32)   # PyTorch layout
  x_nhwc = jnp.transpose(x_nchw, (0, 2, 3, 1))      # kernel layout: NHWC

  params = init_params(k_p, in_channel=C, out_channel=C)
  prepared = prepare_block_params(params, width=W)  # one-time weight prep

  out = proposed_block(x_nhwc, prepared)
  out = jax.block_until_ready(out)

  # Reference on the same bf16-rounded input (kernel I/O is bf16).
  x_in = x_nhwc.astype(jnp.bfloat16).astype(jnp.float32)
  ref = ref_forward(x_in, params)

  # bf16 conv operands / bf16 output store, f32 accumulation -> loose tolerance.
  np.testing.assert_allclose(np.asarray(out.astype(jnp.float32)),
                             np.asarray(ref), rtol=5e-2, atol=5e-2)
  print("KERNEL_OK")
</pallas_src>

<mosaic_0001>
module attributes {stable_mosaic.version = 11 : i64} {
  func.func @_block_kernel(%arg0: i32, %arg1: memref<1x16x128xbf16, #tpu.memory_space<vmem>>, %arg2: memref<3x128x128xbf16, #tpu.memory_space<vmem>>, %arg3: memref<3x128x128xbf16, #tpu.memory_space<vmem>>, %arg4: memref<1x128xf32, #tpu.memory_space<vmem>>, %arg5: memref<1x128xf32, #tpu.memory_space<vmem>>, %arg6: memref<1x128xf32, #tpu.memory_space<vmem>>, %arg7: memref<1x128xf32, #tpu.memory_space<vmem>>, %arg8: memref<1x16x128xbf16, #tpu.memory_space<vmem>>) attributes {dimension_semantics = [#tpu.dimension_semantics<parallel>], iteration_bounds = array<i64: 2>, scalar_prefetch = 0 : i64, scratch_operands = 0 : i64, tpu.core_type = #tpu.core_type<tc>, window_params = [{transform_indices = @transform_0, window_bounds = array<i64: 1, 16, 128>}, {pipeline_mode = #tpu.pipeline_mode<synchronous>, transform_indices = @transform_1, window_bounds = array<i64: 3, 128, 128>}, {pipeline_mode = #tpu.pipeline_mode<synchronous>, transform_indices = @transform_2, window_bounds = array<i64: 3, 128, 128>}, {pipeline_mode = #tpu.pipeline_mode<synchronous>, transform_indices = @transform_3, window_bounds = array<i64: 1, 128>}, {pipeline_mode = #tpu.pipeline_mode<synchronous>, transform_indices = @transform_4, window_bounds = array<i64: 1, 128>}, {pipeline_mode = #tpu.pipeline_mode<synchronous>, transform_indices = @transform_5, window_bounds = array<i64: 1, 128>}, {pipeline_mode = #tpu.pipeline_mode<synchronous>, transform_indices = @transform_6, window_bounds = array<i64: 1, 128>}, {transform_indices = @transform_7, window_bounds = array<i64: 1, 16, 128>}]} {
    %0 = tpu.iota {dimensions = array<i32: 0>} : vector<16x16xi32>
    %1 = tpu.iota {dimensions = array<i32: 1>} : vector<16x16xi32>
    %c1_i32 = arith.constant 1 : i32
    %2 = vector.broadcast %c1_i32 : i32 to vector<16x16xi32>
    %3 = arith.addi %1, %2 : vector<16x16xi32>
    %4 = arith.cmpi eq, %0, %3 : vector<16x16xi32>
    %5 = arith.extui %4 : vector<16x16xi1> to vector<16x16xi32>
    %6 = arith.sitofp %5 : vector<16x16xi32> to vector<16x16xf32>
    %7 = arith.truncf %6 : vector<16x16xf32> to vector<16x16xbf16>
    %c1_i32_0 = arith.constant 1 : i32
    %8 = vector.broadcast %c1_i32_0 : i32 to vector<16x16xi32>
    %9 = arith.addi %0, %8 : vector<16x16xi32>
    %10 = arith.cmpi eq, %1, %9 : vector<16x16xi32>
    %11 = arith.extui %10 : vector<16x16xi1> to vector<16x16xi32>
    %12 = arith.sitofp %11 : vector<16x16xi32> to vector<16x16xf32>
    %13 = arith.truncf %12 : vector<16x16xf32> to vector<16x16xbf16>
    %c0 = arith.constant 0 : index
    %c0_1 = arith.constant 0 : index
    %c0_2 = arith.constant 0 : index
    %14 = vector.load %arg1[%c0, %c0_1, %c0_2] : memref<1x16x128xbf16, #tpu.memory_space<vmem>>, vector<1x16x128xbf16>
    %15 = vector.shape_cast %14 : vector<1x16x128xbf16> to vector<16x128xbf16>
    %16 = arith.extf %15 : vector<16x128xbf16> to vector<16x128xf32>
    %c0_3 = arith.constant 0 : index
    %c0_4 = arith.constant 0 : index
    %17 = vector.load %arg4[%c0_3, %c0_4] : memref<1x128xf32, #tpu.memory_space<vmem>>, vector<1x128xf32>
    %18 = vector.broadcast %17 : vector<1x128xf32> to vector<16x128xf32>
    %19 = arith.mulf %16, %18 : vector<16x128xf32>
    %c0_5 = arith.constant 0 : index
    %c0_6 = arith.constant 0 : index
    %20 = vector.load %arg5[%c0_5, %c0_6] : memref<1x128xf32, #tpu.memory_space<vmem>>, vector<1x128xf32>
    %21 = vector.broadcast %20 : vector<1x128xf32> to vector<16x128xf32>
    %22 = arith.addf %19, %21 : vector<16x128xf32>
    %cst = arith.constant 0.000000e+00 : f32
    %23 = vector.broadcast %cst : f32 to vector<16x128xf32>
    %24 = arith.maximumf %22, %23 : vector<16x128xf32>
    %25 = arith.truncf %24 : vector<16x128xf32> to vector<16x128xbf16>
    %cst_7 = arith.constant dense<0.000000e+00> : vector<16x128xf32>
    %26 = tpu.matmul %7, %25, %cst_7 {dimension_numbers = #tpu.dot_dimension_numbers<[1], [0], [0], [1], [0, 0, 1, 1], [], []>} : vector<16x16xbf16>, vector<16x128xbf16>, vector<16x128xf32> -> vector<16x128xf32>
    %27 = arith.truncf %26 : vector<16x128xf32> to vector<16x128xbf16>
    %cst_8 = arith.constant dense<0.000000e+00> : vector<16x128xf32>
    %28 = tpu.matmul %13, %25, %cst_8 {dimension_numbers = #tpu.dot_dimension_numbers<[1], [0], [0], [1], [0, 0, 1, 1], [], []>} : vector<16x16xbf16>, vector<16x128xbf16>, vector<16x128xf32> -> vector<16x128xf32>
    %29 = arith.truncf %28 : vector<16x128xf32> to vector<16x128xbf16>
    %c0_9 = arith.constant 0 : index
    %c0_10 = arith.constant 0 : index
    %c0_11 = arith.constant 0 : index
    %30 = vector.load %arg2[%c0_9, %c0_10, %c0_11] : memref<3x128x128xbf16, #tpu.memory_space<vmem>>, vector<1x128x128xbf16>
    %31 = vector.shape_cast %30 : vector<1x128x128xbf16> to vector<128x128xbf16>
    %cst_12 = arith.constant dense<0.000000e+00> : vector<16x128xf32>
    %32 = tpu.matmul %27, %31, %cst_12 {dimension_numbers = #tpu.dot_dimension_numbers<[1], [0], [0], [1], [0, 0, 1, 1], [], []>} : vector<16x128xbf16>, vector<128x128xbf16>, vector<16x128xf32> -> vector<16x128xf32>
    %c1 = arith.constant 1 : index
    %c0_13 = arith.constant 0 : index
    %c0_14 = arith.constant 0 : index
    %33 = vector.load %arg2[%c1, %c0_13, %c0_14] : memref<3x128x128xbf16, #tpu.memory_space<vmem>>, vector<1x128x128xbf16>
    %34 = vector.shape_cast %33 : vector<1x128x128xbf16> to vector<128x128xbf16>
    %cst_15 = arith.constant dense<0.000000e+00> : vector<16x128xf32>
    %35 = tpu.matmul %25, %34, %cst_15 {dimension_numbers = #tpu.dot_dimension_numbers<[1], [0], [0], [1], [0, 0, 1, 1], [], []>} : vector<16x128xbf16>, vector<128x128xbf16>, vector<16x128xf32> -> vector<16x128xf32>
    %36 = arith.addf %32, %35 : vector<16x128xf32>
    %c2 = arith.constant 2 : index
    %c0_16 = arith.constant 0 : index
    %c0_17 = arith.constant 0 : index
    %37 = vector.load %arg2[%c2, %c0_16, %c0_17] : memref<3x128x128xbf16, #tpu.memory_space<vmem>>, vector<1x128x128xbf16>
    %38 = vector.shape_cast %37 : vector<1x128x128xbf16> to vector<128x128xbf16>
    %cst_18 = arith.constant dense<0.000000e+00> : vector<16x128xf32>
    %39 = tpu.matmul %29, %38, %cst_18 {dimension_numbers = #tpu.dot_dimension_numbers<[1], [0], [0], [1], [0, 0, 1, 1], [], []>} : vector<16x128xbf16>, vector<128x128xbf16>, vector<16x128xf32> -> vector<16x128xf32>
    %40 = arith.addf %36, %39 : vector<16x128xf32>
    %c0_19 = arith.constant 0 : index
    %c0_20 = arith.constant 0 : index
    %41 = vector.load %arg6[%c0_19, %c0_20] : memref<1x128xf32, #tpu.memory_space<vmem>>, vector<1x128xf32>
    %42 = vector.broadcast %41 : vector<1x128xf32> to vector<16x128xf32>
    %43 = arith.mulf %40, %42 : vector<16x128xf32>
    %c0_21 = arith.constant 0 : index
    %c0_22 = arith.constant 0 : index
    %44 = vector.load %arg7[%c0_21, %c0_22] : memref<1x128xf32, #tpu.memory_space<vmem>>, vector<1x128xf32>
    %45 = vector.broadcast %44 : vector<1x128xf32> to vector<16x128xf32>
    %46 = arith.addf %43, %45 : vector<16x128xf32>
    %cst_23 = arith.constant 0.000000e+00 : f32
    %47 = vector.broadcast %cst_23 : f32 to vector<16x128xf32>
    %48 = arith.maximumf %46, %47 : vector<16x128xf32>
    %49 = arith.truncf %48 : vector<16x128xf32> to vector<16x128xbf16>
    %cst_24 = arith.constant dense<0.000000e+00> : vector<16x128xf32>
    %50 = tpu.matmul %7, %49, %cst_24 {dimension_numbers = #tpu.dot_dimension_numbers<[1], [0], [0], [1], [0, 0, 1, 1], [], []>} : vector<16x16xbf16>, vector<16x128xbf16>, vector<16x128xf32> -> vector<16x128xf32>
    %51 = arith.truncf %50 : vector<16x128xf32> to vector<16x128xbf16>
    %cst_25 = arith.constant dense<0.000000e+00> : vector<16x128xf32>
    %52 = tpu.matmul %13, %49, %cst_25 {dimension_numbers = #tpu.dot_dimension_numbers<[1], [0], [0], [1], [0, 0, 1, 1], [], []>} : vector<16x16xbf16>, vector<16x128xbf16>, vector<16x128xf32> -> vector<16x128xf32>
    %53 = arith.truncf %52 : vector<16x128xf32> to vector<16x128xbf16>
    %c0_26 = arith.constant 0 : index
    %c0_27 = arith.constant 0 : index
    %c0_28 = arith.constant 0 : index
    %54 = vector.load %arg3[%c0_26, %c0_27, %c0_28] : memref<3x128x128xbf16, #tpu.memory_space<vmem>>, vector<1x128x128xbf16>
    %55 = vector.shape_cast %54 : vector<1x128x128xbf16> to vector<128x128xbf16>
    %cst_29 = arith.constant dense<0.000000e+00> : vector<16x128xf32>
    %56 = tpu.matmul %51, %55, %cst_29 {dimension_numbers = #tpu.dot_dimension_numbers<[1], [0], [0], [1], [0, 0, 1, 1], [], []>} : vector<16x128xbf16>, vector<128x128xbf16>, vector<16x128xf32> -> vector<16x128xf32>
    %c1_30 = arith.constant 1 : index
    %c0_31 = arith.constant 0 : index
    %c0_32 = arith.constant 0 : index
    %57 = vector.load %arg3[%c1_30, %c0_31, %c0_32] : memref<3x128x128xbf16, #tpu.memory_space<vmem>>, vector<1x128x128xbf16>
    %58 = vector.shape_cast %57 : vector<1x128x128xbf16> to vector<128x128xbf16>
    %cst_33 = arith.constant dense<0.000000e+00> : vector<16x128xf32>
    %59 = tpu.matmul %49, %58, %cst_33 {dimension_numbers = #tpu.dot_dimension_numbers<[1], [0], [0], [1], [0, 0, 1, 1], [], []>} : vector<16x128xbf16>, vector<128x128xbf16>, vector<16x128xf32> -> vector<16x128xf32>
    %60 = arith.addf %56, %59 : vector<16x128xf32>
    %c2_34 = arith.constant 2 : index
    %c0_35 = arith.constant 0 : index
    %c0_36 = arith.constant 0 : index
    %61 = vector.load %arg3[%c2_34, %c0_35, %c0_36] : memref<3x128x128xbf16, #tpu.memory_space<vmem>>, vector<1x128x128xbf16>
    %62 = vector.shape_cast %61 : vector<1x128x128xbf16> to vector<128x128xbf16>
    %cst_37 = arith.constant dense<0.000000e+00> : vector<16x128xf32>
    %63 = tpu.matmul %53, %62, %cst_37 {dimension_numbers = #tpu.dot_dimension_numbers<[1], [0], [0], [1], [0, 0, 1, 1], [], []>} : vector<16x128xbf16>, vector<128x128xbf16>, vector<16x128xf32> -> vector<16x128xf32>
    %64 = arith.addf %60, %63 : vector<16x128xf32>
    %65 = arith.addf %64, %16 : vector<16x128xf32>
    %66 = arith.truncf %65 : vector<16x128xf32> to vector<16x128xbf16>
    %c0_38 = arith.constant 0 : index
    %c0_39 = arith.constant 0 : index
    %c0_40 = arith.constant 0 : index
    %67 = vector.load %arg8[%c0_38, %c0_39, %c0_40] : memref<1x16x128xbf16, #tpu.memory_space<vmem>>, vector<1x16x128xbf16>
    %68 = vector.shape_cast %67 : vector<1x16x128xbf16> to vector<16x128xbf16>
    %69 = vector.shape_cast %66 : vector<16x128xbf16> to vector<1x16x128xbf16>
    tpu.vector_store %arg8[%c0_38, %c0_39, %c0_40], %69 {strides = array<i32>} : memref<1x16x128xbf16, #tpu.memory_space<vmem>>, vector<1x16x128xbf16>,
    return
  }
  func.func @transform_0(%arg0: i32) -> (i32, i32, i32) {
    %c0_i32 = arith.constant 0 : i32
    %c0_i32_0 = arith.constant 0 : i32
    %c0_i32_1 = arith.constant 0 : i32
    return %arg0, %c0_i32, %c0_i32_0 : i32, i32, i32
  }
  func.func @transform_1(%arg0: i32) -> (i32, i32, i32) {
    %c0_i32 = arith.constant 0 : i32
    %c0_i32_0 = arith.constant 0 : i32
    %c0_i32_1 = arith.constant 0 : i32
    %c0_i32_2 = arith.constant 0 : i32
    return %c0_i32, %c0_i32_0, %c0_i32_1 : i32, i32, i32
  }
  func.func @transform_2(%arg0: i32) -> (i32, i32, i32) {
    %c0_i32 = arith.constant 0 : i32
    %c0_i32_0 = arith.constant 0 : i32
    %c0_i32_1 = arith.constant 0 : i32
    %c0_i32_2 = arith.constant 0 : i32
    return %c0_i32, %c0_i32_0, %c0_i32_1 : i32, i32, i32
  }
  func.func @transform_3(%arg0: i32) -> (i32, i32) {
    %c0_i32 = arith.constant 0 : i32
    %c0_i32_0 = arith.constant 0 : i32
    %c0_i32_1 = arith.constant 0 : i32
    return %c0_i32, %c0_i32_0 : i32, i32
  }
  func.func @transform_4(%arg0: i32) -> (i32, i32) {
    %c0_i32 = arith.constant 0 : i32
    %c0_i32_0 = arith.constant 0 : i32
    %c0_i32_1 = arith.constant 0 : i32
    return %c0_i32, %c0_i32_0 : i32, i32
  }
  func.func @transform_5(%arg0: i32) -> (i32, i32) {
    %c0_i32 = arith.constant 0 : i32
    %c0_i32_0 = arith.constant 0 : i32
    %c0_i32_1 = arith.constant 0 : i32
    return %c0_i32, %c0_i32_0 : i32, i32
  }
  func.func @transform_6(%arg0: i32) -> (i32, i32) {
    %c0_i32 = arith.constant 0 : i32
    %c0_i32_0 = arith.constant 0 : i32
    %c0_i32_1 = arith.constant 0 : i32
    return %c0_i32, %c0_i32_0 : i32, i32
  }
  func.func @transform_7(%arg0: i32) -> (i32, i32, i32) {
    %c0_i32 = arith.constant 0 : i32
    %c0_i32_0 = arith.constant 0 : i32
    %c0_i32_1 = arith.constant 0 : i32
    return %arg0, %c0_i32, %c0_i32_0 : i32, i32, i32
  }
}

</mosaic_0001>

<bundles_post_ra>
// kernel: tpu_custom_call.1
= control target key start
LH: loop header
LB: loop body
LE: loop exit
PB: predicated region body
PF: predicated region fallthrough
CT: control target
= control target key end

     0   :  { %12 = vsyncpa [#allocation3], 0  ;;  %s2321_s0 = inlined_call_operand.hbm [shape: bf16[2,16,128], index: 0, kind: input, shape index: {}]   ;;  %s2322_s1 = inlined_call_operand.hbm [shape: bf16[3,128,128], index: 1, kind: input, shape index: {}]   ;;  %s2323_s2 = inlined_call_operand.hbm [shape: bf16[3,128,128], index: 2, kind: input, shape index: {}]   ;;  %s2324_s3 = inlined_call_operand.vmem [shape: f32[1,128], index: 3, kind: input, shape index: {}]   ;;  %s2325_s4 = inlined_call_operand.vmem [shape: f32[1,128], index: 4, kind: input, shape index: {}]   ;;  %s2326_s5 = inlined_call_operand.vmem [shape: f32[1,128], index: 5, kind: input, shape index: {}]   ;;  %s2327_s6 = inlined_call_operand.vmem [shape: f32[1,128], index: 6, kind: input, shape index: {}]   ;;  %s2328_s7 = inlined_call_operand.hbm [shape: bf16[2,16,128], index: 7, kind: output, shape index: {}]  }
   0x1   :  { %14 = vsyncpa [#allocation3 + $0x1], 0 }
   0x2   :  { %15 = vsyncpa [#allocation6], 0 }
   0x3   :  { %16 = vsyncpa [#allocation4], 0 }
   0x4   :  { %18 = vsyncpa [#allocation4 + $0x1], 0  ;;  %s1962_s24 = smov 0   ;;  %s1964_s25 = smov 0  }
   0x5   :  { %s1966_s26 = smov 0   ;;  %s1968_s27 = smov 0  }
   0x6 LB: > { %s1983_s28 = sadd.s32 4294967295, %s1910_s27   ;;  %s1326_s29 = sadd.s32 4294967294, %s1910_s27   ;;  %s1910_s27 = sphi %s1968_s27, %s2350_s27   ;;  %s1906_s26 = sphi %s1966_s26, %s2349_s26   ;;  %s1902_s25 = sphi %s1964_s25, %s2348_s25   ;;  %s1898_s24 = sphi %s1962_s24, %s2347_s24  }
   0x7   : > { %p44_p0 = scmp.ne.s32.totalorder %s1902_s25, %s1898_s24  ;;  %p2329_p1 = scmp.eq.s32.totalorder %s1983_s28, 0 }
   0x8   : > { %p200_p3 = scmp.eq.s32.totalorder %s1326_s29, 1  ;;  %p1327_p5 = scmp.ge.s32.totalorder %s1910_s27, 1 }
   0x9   : > { %p1992_p4 = por %p2329_p1, %p44_p0  ;;  %p207_p7 = scmp.lt.s32.totalorder %s1910_s27, 3 }
   0xa   : > { %p1997_p6 = por %p200_p3, %p44_p0  ;;  %s1912_s10 = smov [#allocation5]  }
   0xb   : > { %s2333_s30 = scalar_select %p1992_p4, 1, 0 }
   0xc   : > { %s2334_s8 = scalar_select %p1997_p6, 1, 0 }
   0xd   : > { %p2002_p8 = pnand %p1327_p5, %p207_p7  ;;  %s219_s11 = sshll.u32 %s1912_s10, 4  ;;  %s2006_s11 = int_to_ptr.vmem [resolvable:$true] %s219_s11 }
   0xe   : > { %s1913_s13 = smov [#allocation7]   ;;  %s1754_s17 = scalar_lea.hbm %s2322_s1, 3072 }
   0xf   : > { %p1645_p9 = pneg %p2002_p8  ;;  %s232_s14 = sshll.u32 %s1913_s13, 4  ;;  %s2017_s14 = int_to_ptr.vmem [resolvable:$true] %s232_s14 }
  0x10   : > { %p1755_p12 = scmp.ne.s32.totalorder %s2322_s1, %s1754_s17  ;;  %p1761_p5 = scmp.lt.u32.totalorder %s1754_s17, %s2322_s1 }
  0x11   : > { %p2013_p11 = pnand %p1645_p9, %p2329_p1 }
  0x13   : > { %p1756_p13 = pneg %p2013_p11 }
  0x15   : > { %p1757_p0 = pnand %p1756_p13, %p1755_p12 }
  0x17   : > { %p1758_p3 = pneg %p1757_p0 }
  0x19   : > { %p1763_p7 = pnand %p1761_p5, %p1758_p3 }
  0x1b   : > { %1766 = shalt.err (!%p1763_p7)
}
  0x1c   : > { %s1767_s22 = scalar_lea.vmem %s2006_s11, 3072  ;;  %p1775_p2 = scmp.lt.s32.totalorder %s2006_s11, %s2006_s11 }
  0x1d   : > { %p1768_p9 = scmp.ne.s32.totalorder %s2006_s11, %s1767_s22  ;;  %p1776_p12 = scmp.lt.s32.totalorder %s1767_s22, %s1767_s22 }
  0x1f   : > { %p1770_p10 = pnand %p1768_p9, %p1756_p13  ;;  %p1777_p0 = por %p1776_p12, %p1775_p2 }
  0x21   : > { %p1771_p1 = pneg %p1770_p10 }
  0x23   : > { %p1778_p6 = pnand %p1777_p0, %p1771_p1 }
  0x25   : > { %1781 = shalt.err (!%p1778_p6)
}
  0x26   : > { %s2330_s23 = smov 64   ;;  %s1915_s29 = smov 4  }
  0x27   : > { %1648 = dma.hbm_to_vmem [thread:$0]  (!%p2013_p11), %s2322_s1, 3072, %s2006_s11, [#allocation6], %s2330_s23, %s2330_s23, %s1915_s29  }
  0x28   : > { %s1782_s17 = scalar_lea.hbm %s2323_s2, 3072 }
  0x29   : > { %p1783_p1 = scmp.ne.s32.totalorder %s2323_s2, %s1782_s17  ;;  %p1789_p10 = scmp.lt.u32.totalorder %s1782_s17, %s2323_s2 }
  0x2b   : > { %p1785_p2 = pnand %p1783_p1, %p1756_p13 }
  0x2d   : > { %p1786_p6 = pneg %p1785_p2 }
  0x2f   : > { %p1791_p3 = pnand %p1789_p10, %p1786_p6 }
  0x31   : > { %1794 = shalt.err (!%p1791_p3)
}
  0x32   : > { %s1795_s11 = scalar_lea.vmem %s2017_s14, 3072  ;;  %p1803_p12 = scmp.lt.s32.totalorder %s2017_s14, %s2017_s14 }
  0x33   : > { %p1796_p5 = scmp.ne.s32.totalorder %s2017_s14, %s1795_s11  ;;  %p1804_p0 = scmp.lt.s32.totalorder %s1795_s11, %s1795_s11 }
  0x35   : > { %p1798_p7 = pnand %p1796_p5, %p1756_p13  ;;  %p1805_p1 = por %p1804_p0, %p1803_p12 }
  0x37   : > { %p1799_p9 = pneg %p1798_p7 }
  0x39   : > { %p1806_p2 = pnand %p1805_p1, %p1799_p9 }
  0x3b   : > { %1809 = shalt.err (!%p1806_p2)
}
  0x3c   : > { %1651 = dma.hbm_to_vmem [thread:$0]  (!%p2013_p11), %s2323_s2, 3072, %s2017_s14, [#allocation6], %s2330_s23, %s2330_s23, %s1915_s29  }
  0x3d   : > { %s2078_s12 = sadd.s32 1, %s1910_s27   ;;  %s31_s13 = sadd.s32 1, %s1906_s26 }
  0x3e   : > { %s28_s15 = ssub.s32 %s1910_s27, %s2078_s12  ;;  %p38_p13 = scmp.ne.s32.totalorder %s1906_s26, %s1902_s25 }
  0x3f   : > { %p29_p6 = scmp.eq.s32.totalorder %s28_s15, 0  ;;  %p39_p10 = scmp.eq.s32.totalorder %s1910_s27, 0 }
  0x40   : > { %p2337_p3 = scmp.eq.s32.totalorder %s1983_s28, 1  ;;  %p1662_p7 = scmp.lt.s32.totalorder %s1910_s27, 2 }
  0x41   : > { %s2094_s17 = scalar_select %p29_p6, %s1906_s26, %s31_s13  }
  0x42   : > { %p2088_p5 = por %p2337_p3, %p38_p13  ;;  %p40_p9 = por %p39_p10, %p38_p13 }
  0x43   : > { %s258_s18 = sand.u32 1, %s1906_s26   ;;  %s1406_s14 = sshll.u32 %s1910_s27, 7 }
  0x44   : > { %s2338_s16 = scalar_select %p2088_p5, 1, 0 }
  0x45   : > { %s1331_s19 = sshll.u32 %s258_s18, 3  ;;  %s2101_s11 = scalar_lea.hbm %s2321_s0, %s1406_s14 }
  0x46   : > { %s262_s22 = scalar_lea.vmem [#allocation2], %s1331_s19  ;;  %p2105_p11 = pnand %p1662_p7, %p40_p9 }
  0x47   : > { %s269_s10 = sshll.u32 %s262_s22, 4  ;;  %s2109_s15 = scalar_lea.sflag [#allocation3], %s258_s18  ;;  %s2103_s10 = int_to_ptr.vmem [resolvable:$true] %s269_s10 }
  0x48   : > { %s1810_s23 = scalar_lea.hbm %s2101_s11, 128  ;;  %p1812_p0 = pneg %p2105_p11 }
  0x49   : > { %p1811_p12 = scmp.ne.s32.totalorder %s2101_s11, %s1810_s23  ;;  %s1815_s20 = scalar_lea.hbm %s2321_s0, 256 }
  0x4a   : > { %p1816_p13 = scmp.lt.u32.totalorder %s2101_s11, %s2321_s0  ;;  %p1817_p6 = scmp.lt.u32.totalorder %s1815_s20, %s1810_s23 }
  0x4b   : > { %p1813_p1 = pnand %p1812_p0, %p1811_p12  ;;  %p1819_p3 = scmp.lt.u32.totalorder %s1810_s23, %s2101_s11 }
  0x4c   : > { %p1818_p10 = por %p1817_p6, %p1816_p13 }
  0x4d   : > { %p1814_p2 = pneg %p1813_p1 }
  0x4e   : > { %p1820_p7 = por %p1819_p3, %p1818_p10 }
  0x50   : > { %p1821_p9 = pnand %p1820_p7, %p1814_p2 }
  0x52   : > { %1824 = shalt.err (!%p1821_p9)
}
  0x53   : > { %s1825_s18 = scalar_lea.vmem %s2103_s10, 128  ;;  %s1916_s19 = smov [#allocation2]  }
  0x54   : > { %p1826_p12 = scmp.ne.s32.totalorder %s2103_s10, %s1825_s18  ;;  %s1830_s14 = sshll.u32 %s1916_s19, 4  ;;  %s1831_s14 = int_to_ptr.vmem [resolvable:$false] %s1830_s14 }
  0x55   : > { %s1832_s21 = scalar_lea.vmem %s1831_s14, 256  ;;  %p1833_p4 = scmp.lt.s32.totalorder %s2103_s10, %s1831_s14 }
  0x56   : > { %p1828_p1 = pnand %p1826_p12, %p1812_p0  ;;  %p1834_p13 = scmp.lt.s32.totalorder %s1832_s21, %s1825_s18 }
  0x58   : > { %p1829_p5 = pneg %p1828_p1  ;;  %p1835_p6 = por %p1834_p13, %p1833_p4 }
  0x5a   : > { %p1836_p10 = pnand %p1835_p6, %p1829_p5 }
  0x5c   : > { %1839 = shalt.err (!%p1836_p10)
}
  0x5d   : > { %s2340_s23 = smov 64   ;;  %281 = sbr.rel (%p2002_p8) target bundleno = 1074 (0x432), region = 48 }
  0x5e   : > { %1655 = dma.hbm_to_vmem [thread:$0]  (!%p2105_p11), %s2101_s11, 128, %s2103_s10, %s2109_s15, %s2340_s23, %s2340_s23, %s1915_s29  }
  0x5f   : > { %s2143_s20 = sand.u32 (!%p2002_p8), 1, %s1902_s25   ;;  %p2341_p4 = scmp.ne.s32.totalorder (!%p2002_p8), %s2333_s30, 0 }
  0x60   : > { %s1335_s22 = sshll.u32 (!%p2002_p8), %s2143_s20, 3  ;;  %s284_s18 = scalar_lea.sflag (!%p2002_p8), [#allocation3], %s2143_s20 }
  0x61   : > { %s287_s13 = scalar_lea.vmem (!%p2002_p8), [#allocation2], %s1335_s22 }
  0x64   : > { %1885 = dma.done.wait (%p2341_p4), %s284_s18, 128  }
  0x65   : > { %1887 = vsyncadd (%p2341_p4), %s284_s18, 4294967168  ;;  %p2342_p5 = scmp.eq.s32.totalorder %s1983_s28, 0 }
  0x67   : > { %1889 = dma.done.wait (%p2342_p5), [#allocation6], 6144   ;;  %p2343_p8 = pmov %p2342_p5 }
  0x68   : > { %v327_v0 = vlaneseq  ;;  %v1917_v1 = vmov 0.0   ;;  %vm1918_vm0 = vmmov 0   ;;  %v2163_v4 = vld [vmem:[%s287_s13] sm:$0xff]   ;;  %vm374_vm3 = vcmask 130048   ;;  %v1706_v25 = vld [vmem:[#allocation5 + $0x40] sm:$0xff]   ;;  %v1707_v27 = vld [vmem:[#allocation5 + $0x48] sm:$0xff]  }
  0x69   : > { %1891 = vsyncadd (%p2343_p8), [#allocation6], 4294961152  ;;  %1481 = vmatprep.subr.bf16.mxu0 %v1917_v1  ;;  %1483 = vmatprep.mubr.msk.bf16.mxu0 %vm1918_vm0, %v1917_v1  ;;  %v1343_v5 = vld [vmem:[%s2324_s3] ss:$0 sm:$0xff]  ;;  %v1412_v8 = vunpack.c.l.bf16 %v2163_v4  ;;  %v1413_v9 = vunpack.c.h.bf16 %v2163_v4  ;;  %v1709_v29 = vld [vmem:[#allocation5 + $0x58] sm:$0xff]   ;;  %s1409_s21 = sshll.u32 %s1983_s28, 7 }
  0x6a   : > { %1553 = vmatprep.subr.bf16.mxu1 %v1917_v1  ;;  %1555 = vmatprep.mubr.msk.bf16.mxu1 %vm1918_vm0, %v1917_v1  ;;  %v328_v2 = vshrl.u32 %v327_v0, 7  ;;  %v331_v3 = vand.u32 127, %v327_v0  ;;  %v1344_v10 = vld [vmem:[%s2325_s4] ss:$0 sm:$0xff]  ;;  %v1710_v30 = vld [vmem:[#allocation5 + $0x60] sm:$0xff]   ;;  %v1711_v31 = vld [vmem:[#allocation5 + $0x68] sm:$0xff]   ;;  %s2275_s9 = scalar_lea.hbm %s2328_s7, %s1409_s21 }
  0x6b   : > { %v360_v11 = vmul.f32 %v1412_v8, %v1343_v5  ;;  %v361_v12 = vmul.f32 %v1413_v9, %v1343_v5  ;;  %v1708_v28 = vld [vmem:[#allocation5 + $0x50] sm:$0xff]   ;;  %v1713_v33 = vld [vmem:[#allocation5 + $0x78] sm:$0xff]   ;;  %v1714_v34 = vld [vmem:[#allocation5] sm:$0xff]   ;;  %s325_s23 = scalar_lea.vmem [#allocation8], %s1335_s22  ;;  %s1221_s28 = scalar_lea.sflag [#allocation4], %s2143_s20 }
  0x6c   : > { %v329_v6 = vadd.s32 8, %v328_v2  ;;  %v332_v7 = vadd.s32 1, %v331_v3  ;;  %v340_v16 = vadd.s32 1, %v328_v2  ;;  %v1712_v32 = vld [vmem:[#allocation5 + $0x70] sm:$0xff]   ;;  %v1715_v35 = vld [vmem:[#allocation5 + $0x8] sm:$0xff]   ;;  %v1717_v37 = vld [vmem:[#allocation5 + $0x18] sm:$0xff]  }
  0x6d   : > { %v369_v13 = vadd.f32 %v1344_v10, %v360_v11  ;;  %v370_v14 = vadd.f32 %v1344_v10, %v361_v12  ;;  %v1716_v36 = vld [vmem:[#allocation5 + $0x10] sm:$0xff]   ;;  %v1718_v38 = vld [vmem:[#allocation5 + $0x20] sm:$0xff]   ;;  %v1719_v39 = vld [vmem:[#allocation5 + $0x28] sm:$0xff]   ;;  %s1234_s18 = sshll.u32 %s325_s23, 4  ;;  %p2344_p0 = scmp.ne.s32.totalorder %s2338_s16, 0  ;;  %s2277_s18 = int_to_ptr.vmem [resolvable:$true] %s1234_s18 }
  0x6e   : > { %vm333_vm1 = vcmp.eq.s32.totalorder %v328_v2, %v332_v7  ;;  %vm334_vm2 = vcmp.eq.s32.totalorder %v329_v6, %v332_v7  ;;  %v341_v15 = vadd.s32 1, %v329_v6  ;;  %vm342_vm4 = vcmp.eq.s32.totalorder %v331_v3, %v340_v16  ;;  %v1720_v40 = vld [vmem:[#allocation5 + $0x30] sm:$0xff]   ;;  %v1721_v41 = vld [vmem:[#allocation5 + $0x38] sm:$0xff]   ;;  %v1722_v45 = vld [vmem:[#allocation5 + $0x80] sm:$0xff]   ;;  %s1840_s22 = scalar_lea.vmem %s2277_s18, 128  ;;  %s1919_s29 = smov [#allocation8]  }
  0x6f   : > { %v371_v17 = vmax.f32 %v369_v13, 0.0  ;;  %v372_v18 = vmax.f32 %v370_v14, 0.0  ;;  %v1339_v19 = vsel %vm333_vm1, 1.0, %v1917_v1  ;;  %v1340_v20 = vsel %vm334_vm2, 1.0, %v1917_v1  ;;  %v1723_v48 = vld [vmem:[#allocation5 + $0x88] sm:$0xff]   ;;  %v1724_v51 = vld [vmem:[#allocation5 + $0x90] sm:$0xff]   ;;  %p1841_p11 = scmp.ne.s32.totalorder %s2277_s18, %s1840_s22 }
  0x70   : > { %v2179_v22 = vpack.c.bf16 %v1340_v20, %v1339_v19  ;;  %vm343_vm5 = vcmp.eq.s32.totalorder %v331_v3, %v341_v15  ;;  %v1341_v23 = vsel %vm342_vm4, 1.0, %v1917_v1  ;;  %v1725_v55 = vld [vmem:[#allocation5 + $0x98] sm:$0xff]   ;;  %v1726_v56 = vld [vmem:[#allocation5 + $0xa0] sm:$0xff]   ;;  %v1727_v57 = vld [vmem:[#allocation5 + $0xa8] sm:$0xff]   ;;  %s1844_s11 = sshll.u32 %s1919_s29, 4  ;;  %s1845_s11 = int_to_ptr.vmem [resolvable:$false] %s1844_s11 }
  0x71   : > { %v373_v21 = vpack.c.bf16 %v372_v18, %v371_v17  ;;  %v1342_v24 = vsel %vm343_vm5, 1.0, %v1917_v1  ;;  %v1728_v58 = vld [vmem:[#allocation5 + $0xb0] sm:$0xff]   ;;  %v1729_v59 = vld [vmem:[#allocation5 + $0xb8] sm:$0xff]   ;;  %v1730_v13 = vld [vmem:[#allocation7 + $0x40] sm:$0xff]   ;;  %p1842_p2 = pnand %p1841_p11, %p2344_p0  ;;  %s1846_s10 = scalar_lea.vmem %s1845_s11, 256 }
  0x72   : > { %v2189_v26 = vpack.c.bf16 %v1342_v24, %v1341_v23  ;;  %v1371_v60 = vld [vmem:[%s2326_s5] ss:$0 sm:$0xff]  ;;  %v1731_v14 = vld [vmem:[#allocation7 + $0x48] sm:$0xff]   ;;  %v1733_v16 = vld [vmem:[#allocation7 + $0x58] sm:$0xff]   ;;  %p1847_p7 = scmp.lt.s32.totalorder %s2277_s18, %s1845_s11  ;;  %p1848_p9 = scmp.lt.s32.totalorder %s1846_s10, %s1840_s22 }
  0x73   : > { %1482 = vmatpush3.bf16.msra.mxu0 %v373_v21  ;;  %v1372_v62 = vld [vmem:[%s2327_s6] ss:$0 sm:$0xff]  ;;  %v1734_v17 = vld [vmem:[#allocation7 + $0x60] sm:$0xff]   ;;  %v1735_v18 = vld [vmem:[#allocation7 + $0x68] sm:$0xff]   ;;  %p1843_p3 = pneg %p1842_p2 }
  0x74   : > { %1487 = vmatprep.subr.bf16.mxu0 %v1917_v1  ;;  %v1732_v15 = vld [vmem:[#allocation7 + $0x50] sm:$0xff]   ;;  %v1737_v20 = vld [vmem:[#allocation7 + $0x78] sm:$0xff]   ;;  %p1849_p12 = por %p1848_p9, %p1847_p7 }
  0x75   : > { %v1736_v19 = vld [vmem:[#allocation7 + $0x70] sm:$0xff]   ;;  %v1741_v24 = vld [vmem:[#allocation7 + $0x18] sm:$0xff]  }
  0x76   : > { %1484 = vmatmul.mubr.msk.bf16.vlgmr.msra.gmra.mrb[0].mxu0 %vm374_vm3, %v2179_v22  ;;  %v1740_v23 = vld [vmem:[#allocation7 + $0x10] sm:$0xff]   ;;  %p1850_p1 = pnand %p1849_p12, %p1843_p3 }
  0x77   : > { %1488 = vmatpush3.bf16.msra.mxu0 %v373_v21  ;;  %1489 = vmatprep.mubr.msk.bf16.mxu0 %vm1918_vm0, %v1917_v1 }
  0x78   : > { %1493 = vmatprep.subr.bf16.mxu0 %v1917_v1 }
  0x7e   : > { %1490 = vmatmul.mubr.msk.bf16.vlgmr.msra.gmra.mrb[4].mxu0 %vm374_vm3, %v2189_v26 }
  0x7f   : > { %1494 = vmatpush3.bf16.msra.mxu0 %v1706_v25  ;;  %1509 = vmatprep.mubr.msk.bf16.mxu0 %vm1918_vm0, %v1917_v1  ;;  %v1742_v25 = vld [vmem:[#allocation7 + $0x20] sm:$0xff]  }
  0x80   : > { %1495 = vmatprep.subr.bf16.mxu0 %v1917_v1 }
  0x83   : > { %1496 = vmatpush3.bf16.msra.mxu0 %v1707_v27  ;;  %v1744_v27 = vld [vmem:[#allocation7 + $0x30] sm:$0xff]  }
  0x84   : > { %1497 = vmatprep.subr.bf16.mxu0 %v1917_v1 }
  0x87   : > { %1498 = vmatpush3.bf16.msra.mxu0 %v1708_v28  ;;  %v1745_v28 = vld [vmem:[#allocation7 + $0x38] sm:$0xff]  }
  0x88   : > { %1499 = vmatprep.subr.bf16.mxu0 %v1917_v1 }
  0x8b   : > { %1500 = vmatpush3.bf16.msra.mxu0 %v1709_v29 }
  0x8c   : > { %1501 = vmatprep.subr.bf16.mxu0 %v1917_v1 }
  0x8f   : > { %1502 = vmatpush3.bf16.msra.mxu0 %v1710_v30 }
  0x90   : > { %1503 = vmatprep.subr.bf16.mxu0 %v1917_v1 }
  0x93   : > { %1504 = vmatpush3.bf16.msra.mxu0 %v1711_v31 }
  0x94   : > { %1505 = vmatprep.subr.bf16.mxu0 %v1917_v1 }
  0x97   : > { %1506 = vmatpush3.bf16.msra.mxu0 %v1712_v32  ;;  %v1746_v32 = vld [vmem:[#allocation7 + $0x80] sm:$0xff]  }
  0x98   : > { %1507 = vmatprep.subr.bf16.mxu0 %v1917_v1 }
  0x9b   : > { %1508 = vmatpush3.bf16.msra.mxu0 %v1713_v33 }
  0x9c   : > { %1513 = vmatprep.subr.bf16.mxu0 %v1917_v1 }
  0x9e   : > { %1510 = vmatmul.mubr.bf16.vlgmr.msra.gmra.mrb[8].mxu0 %v373_v21  ;;  %v1738_v21 = vld [vmem:[#allocation7] sm:$0xff]  }
  0x9f   : > { %1514 = vmatpush3.bf16.msra.mxu0 %v1714_v34  ;;  %1529 = vmatprep.mubr.msk.bf16.mxu0 %vm1918_vm0, %v1917_v1 }
  0xa0   : > { %1515 = vmatprep.subr.bf16.mxu0 %v1917_v1 }
  0xa3   : > { %1516 = vmatpush3.bf16.msra.mxu0 %v1715_v35  ;;  %v1747_v35 = vld [vmem:[#allocation7 + $0x88] sm:$0xff]  }
  0xa4   : > { %1517 = vmatprep.subr.bf16.mxu0 %v1917_v1 }
  0xa7   : > { %1518 = vmatpush3.bf16.msra.mxu0 %v1716_v36 }
  0xa8   : > { %1519 = vmatprep.subr.bf16.mxu0 %v1917_v1 }
  0xab   : > { %1520 = vmatpush3.bf16.msra.mxu0 %v1717_v37 }
  0xac   : > { %1521 = vmatprep.subr.bf16.mxu0 %v1917_v1 }
  0xaf   : > { %1522 = vmatpush3.bf16.msra.mxu0 %v1718_v38  ;;  %v1748_v38 = vld [vmem:[#allocation7 + $0x90] sm:$0xff]  }
  0xb0   : > { %1523 = vmatprep.subr.bf16.mxu0 %v1917_v1 }
  0xb3   : > { %1524 = vmatpush3.bf16.msra.mxu0 %v1719_v39 }
  0xb4   : > { %1525 = vmatprep.subr.bf16.mxu0 %v1917_v1 }
  0xb7   : > { %1526 = vmatpush3.bf16.msra.mxu0 %v1720_v40 }
  0xb8   : > { %1527 = vmatprep.subr.bf16.mxu0 %v1917_v1 }
  0xbb   : > { %1528 = vmatpush3.bf16.msra.mxu0 %v1721_v41 }
  0xbc   : > { %1533 = vmatprep.subr.bf16.mxu0 %v1917_v1 }
 0x149   : > { %v412_v42 = vpop.f32.mrb[0].mxu0 }
 0x14a   : > { %v1485_v43 = vpop.f32.mrb[1].mxu0 }
 0x14b   : > { %v415_v44 = vpop.f32.mrb[2].mxu0  ;;  %v1750_v43 = vld [vmem:[#allocation7 + $0xa0] sm:$0xff]  }
 0x14c   : > { %v419_v46 = vpack.c.bf16 %v415_v44, %v412_v42  ;;  %v1486_v47 = vpop.f32.mrb[3].mxu0  ;;  %v1749_v42 = vld [vmem:[#allocation7 + $0x98] sm:$0xff]   ;;  %v1751_v44 = vld [vmem:[#allocation7 + $0xa8] sm:$0xff]  }
 0x14e   : > { %1530 = vmatmul.mubr.bf16.vlgmr.msra.gmra.mrb[8].mxu0 %v419_v46  ;;  %v1753_v46 = vld [vmem:[#allocation7 + $0xb8] sm:$0xff]  }
 0x14f   : > { %1534 = vmatpush3.bf16.msra.mxu0 %v1722_v45  ;;  %1549 = vmatprep.mubr.msk.bf16.mxu0 %vm1918_vm0, %v1917_v1  ;;  %v1752_v45 = vld [vmem:[#allocation7 + $0xb0] sm:$0xff]  }
 0x150   : > { %1535 = vmatprep.subr.bf16.mxu0 %v1917_v1 }
 0x151   : > { %v457_v49 = vpop.f32.mrb[4].mxu0 }
 0x152   : > { %v1491_v50 = vpop.f32.mrb[5].mxu0 }
 0x153   : > { %1536 = vmatpush3.bf16.msra.mxu0 %v1723_v48  ;;  %v460_v52 = vpop.f32.mrb[6].mxu0 }
 0x154   : > { %1537 = vmatprep.subr.bf16.mxu0 %v1917_v1  ;;  %v464_v53 = vpack.c.bf16 %v460_v52, %v457_v49  ;;  %v1492_v54 = vpop.f32.mrb[7].mxu0 }
 0x157   : > { %1538 = vmatpush3.bf16.msra.mxu0 %v1724_v51 }
 0x158   : > { %1539 = vmatprep.subr.bf16.mxu0 %v1917_v1 }
 0x15b   : > { %1540 = vmatpush3.bf16.msra.mxu0 %v1725_v55 }
 0x15c   : > { %1541 = vmatprep.subr.bf16.mxu0 %v1917_v1 }
 0x15f   : > { %1542 = vmatpush3.bf16.msra.mxu0 %v1726_v56 }
 0x160   : > { %1543 = vmatprep.subr.bf16.mxu0 %v1917_v1 }
 0x163   : > { %1544 = vmatpush3.bf16.msra.mxu0 %v1727_v57 }
 0x164   : > { %1545 = vmatprep.subr.bf16.mxu0 %v1917_v1 }
 0x167   : > { %1546 = vmatpush3.bf16.msra.mxu0 %v1728_v58 }
 0x168   : > { %1547 = vmatprep.subr.bf16.mxu0 %v1917_v1 }
 0x16b   : > { %1548 = vmatpush3.bf16.msra.mxu0 %v1729_v59 }
 0x16e   : > { %1550 = vmatmul.mubr.bf16.vlgmr.msra.gmra.mrb[8].mxu0 %v464_v53 }
 0x241   : > { %v775_v61 = vpop.f32.mrb[8].mxu0 }
 0x242   : > { %v791_v63 = vmul.f32 %v1371_v60, %v775_v61  ;;  %v1551_v0 = vpop.f32.mrb[9].mxu0 }
 0x243   : > { %v778_v2 = vpop.f32.mrb[10].mxu0 }
 0x244   : > { %v800_v3 = vadd.f32 %v1372_v62, %v791_v63  ;;  %v792_v5 = vmul.f32 %v1371_v60, %v778_v2  ;;  %v1552_v6 = vpop.f32.mrb[11].mxu0 }
 0x246   : > { %v801_v7 = vadd.f32 %v1372_v62, %v792_v5  ;;  %v802_v10 = vmax.f32 %v800_v3, 0.0 }
 0x248   : > { %v803_v11 = vmax.f32 %v801_v7, 0.0 }
 0x24a   : > { %v804_v12 = vpack.c.bf16 %v803_v11, %v802_v10 }
 0x24c   : > { %1554 = vmatpush3.bf16.msra.mxu1 %v804_v12 }
 0x24d   : > { %1559 = vmatprep.subr.bf16.mxu1 %v1917_v1 }
 0x24f   : > { %1556 = vmatmul.mubr.msk.bf16.vlgmr.msra.gmra.mrb[0].mxu1 %vm374_vm3, %v2179_v22  ;;  %v1739_v22 = vld [vmem:[#allocation7 + $0x8] sm:$0xff]  }
 0x250   : > { %1560 = vmatpush3.bf16.msra.mxu1 %v804_v12  ;;  %1561 = vmatprep.mubr.msk.bf16.mxu1 %vm1918_vm0, %v1917_v1 }
 0x251   : > { %1565 = vmatprep.subr.bf16.mxu1 %v1917_v1 }
 0x257   : > { %1562 = vmatmul.mubr.msk.bf16.vlgmr.msra.gmra.mrb[4].mxu1 %vm374_vm3, %v2189_v26  ;;  %v1743_v26 = vld [vmem:[#allocation7 + $0x28] sm:$0xff]  }
 0x258   : > { %1566 = vmatpush3.bf16.msra.mxu1 %v1730_v13  ;;  %1581 = vmatprep.mubr.msk.bf16.mxu1 %vm1918_vm0, %v1917_v1 }
 0x259   : > { %1567 = vmatprep.subr.bf16.mxu1 %v1917_v1 }
 0x25c   : > { %1568 = vmatpush3.bf16.msra.mxu1 %v1731_v14 }
 0x25d   : > { %1569 = vmatprep.subr.bf16.mxu1 %v1917_v1 }
 0x260   : > { %1570 = vmatpush3.bf16.msra.mxu1 %v1732_v15 }
 0x261   : > { %1571 = vmatprep.subr.bf16.mxu1 %v1917_v1 }
 0x264   : > { %1572 = vmatpush3.bf16.msra.mxu1 %v1733_v16 }
 0x265   : > { %1573 = vmatprep.subr.bf16.mxu1 %v1917_v1 }
 0x268   : > { %1574 = vmatpush3.bf16.msra.mxu1 %v1734_v17 }
 0x269   : > { %1575 = vmatprep.subr.bf16.mxu1 %v1917_v1 }
 0x26c   : > { %1576 = vmatpush3.bf16.msra.mxu1 %v1735_v18 }
 0x26d   : > { %1577 = vmatprep.subr.bf16.mxu1 %v1917_v1 }
 0x270   : > { %1578 = vmatpush3.bf16.msra.mxu1 %v1736_v19 }
 0x271   : > { %1579 = vmatprep.subr.bf16.mxu1 %v1917_v1 }
 0x274   : > { %1580 = vmatpush3.bf16.msra.mxu1 %v1737_v20 }
 0x275   : > { %1585 = vmatprep.subr.bf16.mxu1 %v1917_v1 }
 0x277   : > { %1582 = vmatmul.mubr.bf16.vlgmr.msra.gmra.mrb[8].mxu1 %v804_v12 }
 0x278   : > { %1586 = vmatpush3.bf16.msra.mxu1 %v1738_v21  ;;  %1601 = vmatprep.mubr.msk.bf16.mxu1 %vm1918_vm0, %v1917_v1 }
 0x279   : > { %1587 = vmatprep.subr.bf16.mxu1 %v1917_v1 }
 0x27c   : > { %1588 = vmatpush3.bf16.msra.mxu1 %v1739_v22 }
 0x27d   : > { %1589 = vmatprep.subr.bf16.mxu1 %v1917_v1 }
 0x280   : > { %1590 = vmatpush3.bf16.msra.mxu1 %v1740_v23 }
 0x281   : > { %1591 = vmatprep.subr.bf16.mxu1 %v1917_v1 }
 0x284   : > { %1592 = vmatpush3.bf16.msra.mxu1 %v1741_v24 }
 0x285   : > { %1593 = vmatprep.subr.bf16.mxu1 %v1917_v1 }
 0x288   : > { %1594 = vmatpush3.bf16.msra.mxu1 %v1742_v25 }
 0x289   : > { %1595 = vmatprep.subr.bf16.mxu1 %v1917_v1 }
 0x28c   : > { %1596 = vmatpush3.bf16.msra.mxu1 %v1743_v26 }
 0x28d   : > { %1597 = vmatprep.subr.bf16.mxu1 %v1917_v1 }
 0x290   : > { %1598 = vmatpush3.bf16.msra.mxu1 %v1744_v27 }
 0x291   : > { %1599 = vmatprep.subr.bf16.mxu1 %v1917_v1 }
 0x294   : > { %1600 = vmatpush3.bf16.msra.mxu1 %v1745_v28 }
 0x295   : > { %1605 = vmatprep.subr.bf16.mxu1 %v1917_v1 }
 0x322   : > { %v839_v29 = vpop.f32.mrb[0].mxu1 }
 0x323   : > { %v1557_v30 = vpop.f32.mrb[1].mxu1 }
 0x324   : > { %v842_v31 = vpop.f32.mrb[2].mxu1 }
 0x325   : > { %v846_v33 = vpack.c.bf16 %v842_v31, %v839_v29  ;;  %v1558_v34 = vpop.f32.mrb[3].mxu1 }
 0x327   : > { %1602 = vmatmul.mubr.bf16.vlgmr.msra.gmra.mrb[12].mxu1 %v846_v33 }
 0x328   : > { %1606 = vmatpush3.bf16.msra.mxu1 %v1746_v32  ;;  %1621 = vmatprep.mubr.msk.bf16.mxu1 %vm1918_vm0, %v1917_v1 }
 0x329   : > { %1607 = vmatprep.subr.bf16.mxu1 %v1917_v1 }
 0x32a   : > { %v881_v36 = vpop.f32.mrb[4].mxu1 }
 0x32b   : > { %v1563_v37 = vpop.f32.mrb[5].mxu1 }
 0x32c   : > { %1608 = vmatpush3.bf16.msra.mxu1 %v1747_v35  ;;  %v884_v39 = vpop.f32.mrb[6].mxu1 }
 0x32d   : > { %1609 = vmatprep.subr.bf16.mxu1 %v1917_v1  ;;  %v888_v40 = vpack.c.bf16 %v884_v39, %v881_v36  ;;  %v1564_v41 = vpop.f32.mrb[7].mxu1 }
 0x330   : > { %1610 = vmatpush3.bf16.msra.mxu1 %v1748_v38 }
 0x331   : > { %1611 = vmatprep.subr.bf16.mxu1 %v1917_v1 }
 0x334   : > { %1612 = vmatpush3.bf16.msra.mxu1 %v1749_v42 }
 0x335   : > { %1613 = vmatprep.subr.bf16.mxu1 %v1917_v1 }
 0x338   : > { %1614 = vmatpush3.bf16.msra.mxu1 %v1750_v43 }
 0x339   : > { %1615 = vmatprep.subr.bf16.mxu1 %v1917_v1 }
 0x33c   : > { %1616 = vmatpush3.bf16.msra.mxu1 %v1751_v44 }
 0x33d   : > { %1617 = vmatprep.subr.bf16.mxu1 %v1917_v1 }
 0x340   : > { %1618 = vmatpush3.bf16.msra.mxu1 %v1752_v45 }
 0x341   : > { %1619 = vmatprep.subr.bf16.mxu1 %v1917_v1 }
 0x344   : > { %1620 = vmatpush3.bf16.msra.mxu1 %v1753_v46 }
 0x347   : > { %1622 = vmatmul.mubr.bf16.vlgmr.msra.gmra.mrb[16].mxu1 %v888_v40 }
 0x34a   : > { %v1004_v47 = vpop.f32.mrb[8].mxu1 }
 0x34b   : > { %v1583_v48 = vpop.f32.mrb[9].mxu1 }
 0x34c   : > { %v1007_v49 = vpop.f32.mrb[10].mxu1 }
 0x34d   : > { %v1584_v50 = vpop.f32.mrb[11].mxu1 }
 0x3fa   : > { %v1093_v51 = vpop.f32.mrb[12].mxu1 }
 0x3fb   : > { %v1094_v52 = vadd.f32 %v1093_v51, %v1004_v47  ;;  %v1603_v53 = vpop.f32.mrb[13].mxu1 }
 0x3fc   : > { %v1096_v54 = vpop.f32.mrb[14].mxu1 }
 0x3fd   : > { %v1097_v55 = vadd.f32 %v1096_v54, %v1007_v49  ;;  %v1604_v56 = vpop.f32.mrb[15].mxu1 }
 0x41a   : > { %v1199_v57 = vpop.f32.mrb[16].mxu1 }
 0x41b   : > { %v1206_v58 = vadd.f32 %v1199_v57, %v1094_v52  ;;  %v1623_v59 = vpop.f32.mrb[17].mxu1 }
 0x41c   : > { %v1202_v1 = vpop.f32.mrb[18].mxu1 }
 0x41d   : > { %v1207_v60 = vadd.f32 %v1202_v1, %v1097_v55  ;;  %v1624_v61 = vpop.f32.mrb[19].mxu1  ;;  %v1208_v62 = vadd.f32 %v1412_v8, %v1206_v58 }
 0x41f   : > { %v1209_v63 = vadd.f32 %v1413_v9, %v1207_v60 }
 0x421   : > { %v1417_v0 = vpack.c.bf16 %v1209_v63, %v1208_v62 }
 0x423   : > { %1418 = vst [vmem:[%s325_s23] sm:$0xff] %v1417_v0  }
 0x424   : > { %1853 = shalt.err (!%p1850_p1)
}
 0x425   : > { %s1854_s15 = scalar_lea.hbm %s2275_s9, 128  ;;  %s1858_s21 = scalar_lea.hbm %s2328_s7, 256 }
 0x426   : > { %p1855_p13 = scmp.ne.s32.totalorder %s2275_s9, %s1854_s15  ;;  %p1859_p4 = scmp.lt.u32.totalorder %s2275_s9, %s2328_s7 }
 0x427   : > { %p1860_p5 = scmp.lt.u32.totalorder %s1858_s21, %s1854_s15  ;;  %p1862_p11 = scmp.lt.u32.totalorder %s1854_s15, %s2275_s9 }
 0x428   : > { %p1856_p6 = pnand %p1855_p13, %p2344_p0 }
 0x429   : > { %p1861_p8 = por %p1860_p5, %p1859_p4 }
 0x42a   : > { %p1857_p10 = pneg %p1856_p6 }
 0x42b   : > { %p1863_p2 = por %p1862_p11, %p1861_p8 }
 0x42d   : > { %p1864_p3 = pnand %p1863_p2, %p1857_p10 }
 0x42f   : > { %1867 = shalt.err (!%p1864_p3)
}
 0x430   : > { %s1920_s30 = smov 64   ;;  %s1921_s22 = smov 4  }
 0x431   : > { %1643 = dma.vmem_to_hbm [thread:$0]  (%p2344_p0), %s2277_s18, 128, %s2275_s9, %s1221_s28, %s1920_s30, %s1920_s30, %s1921_s22  }
 0x432 PF: > { %s1249_s29 = sand.u32 1, %s1898_s24   ;;  %p2345_p7 = scmp.ne.s32.totalorder %s2334_s8, 0 }
 0x433   : > { %p2346_p9 = scmp.ge.s32.totalorder %s1910_s27, 2  ;;  %s1250_s11 = scalar_lea.sflag [#allocation4], %s1249_s29 }
 0x435   : > { %p1657_p12 = pnand %p2346_p9, %p2345_p7 }
 0x437   : > { %1893 = dma.done.wait (!%p1657_p12), %s1250_s11, 128  }
 0x438   : > { %1895 = vsyncadd (!%p1657_p12), %s1250_s11, 4294967168  ;;  %p21_p1 = scmp.ge.s32.totalorder %s2078_s12, 4   ;;  %s2347_s24 = smov %s1902_s25 }
 0x439   : > { %s2348_s25 = smov %s1906_s26  ;;  %s2349_s26 = smov %s2094_s17 }
 0x43a   : > { %s2350_s27 = smov %s2078_s12  ;;  %23 = sbr.rel (!%p21_p1) target bundleno = 6 (0x6), region = 105 }
 0x441   :  { %1255 = vsyncpa [#allocation3], 1 }
 0x442   :  { %1257 = vsyncpa [#allocation3 + $0x1], 1 }
 0x443   :  { %1258 = vsyncpa [#allocation6], 1 }
 0x444   :  { %1259 = vsyncpa [#allocation4], 1 }
 0x445   :  { %1261 = vsyncpa [#allocation4 + $0x1], 1 }

</bundles_post_ra>
